<compile_context>
chip_gen: v6e
topology: v6e:2x2x1
jax: 0.10.0
libtpu: 0.0.40
codegen_flags: <defaults>
</compile_context>

<pallas_src>
import functools
import math

import jax
import jax.numpy as jnp
from jax import lax
from jax.experimental import pallas as pl
from jax.experimental.pallas import tpu as pltpu

_LANE = 128      # lane width
_SUBLANE = 8     # sublane width
_TM_MAX = 512    # max batch rows per tile
_TK_MAX = 4096   # max feature columns per tile (8 MiB of f32 x per buffer at tm=512)


def _round_up(x, m):
    return ((x + m - 1) // m) * m


def _logistic_kernel(x_ref, w_ref, thr_ref, o_ref, acc_ref, *,
                     tk, valid_cols, needs_mask):
    """One (tm, tk) tile of the logistic head, VPU-only reduction.

    x_ref:   (tm, tk)    f32 VMEM   streamed activation tile
    w_ref:   (1, tk)     f32 VMEM   lane-major weight row slice
    thr_ref: (1, 1)      f32 SMEM   folded threshold: logit(t) - bias
    o_ref:   (tm, 1)     f32 VMEM   {0,1} predictions for this batch tile
    acc_ref: (tm, <=128) f32 VMEM   lane-full partial-sum accumulator (resident over k)
    """
    k = pl.program_id(1)

    @pl.when(k == 0)
    def _():
        acc_ref[...] = jnp.zeros_like(acc_ref)

    chunk = min(tk, _LANE)           # tk is a multiple of 128, or tk == D < 128
    if needs_mask:
        # Global column index of the lanes of chunk 0 in this tile (hoisted once).
        col0 = k * tk + lax.broadcasted_iota(jnp.int32, (1, chunk), 1)

    # Per-lane multiply-accumulate: (tm, chunk) x-slice * (1, chunk) w-slice, VPU only.
    for c in range(tk // chunk):
        lo = c * chunk
        prod = x_ref[:, lo:lo + chunk] * w_ref[:, lo:lo + chunk]
        if needs_mask:
            # Zero out contributions from columns >= D (ragged last feature tile);
            # jnp.where selects, so garbage (even NaN/Inf) OOB reads never propagate.
            prod = jnp.where((col0 + lo) < valid_cols, prod, 0.0)
        acc_ref[...] += prod

    @pl.when(k == pl.num_programs(1) - 1)
    def _():
        # Single cross-lane (XLU) reduction + compare against the folded
        # logit-space threshold:  sigmoid(z + b) > t  <=>  z > logit(t) - b.
        logits = jnp.sum(acc_ref[...], axis=1, keepdims=True)      # (tm, 1)
        o_ref[...] = (logits > thr_ref[0, 0]).astype(jnp.float32)


def logistic_net_forward(x, weight, bias, prediction_threshold):
    """x: (B, ...) activations; weight: (1, D) (PyTorch Linear layout); bias: (1,).

    Returns (B, 1) float32 of {0.0, 1.0} == (sigmoid(flatten(x) @ w.T + b) > t).float()
    """
    B = x.shape[0]
    D = math.prod(x.shape[1:])
    # TODO(synk): if the upstream producer already emits bf16 activations, stream them
    # directly (halves HBM bytes); do NOT add a separate cast pass here.
    x_flat = x.reshape(B, D).astype(jnp.float32)          # nn.Flatten semantics (row-major)
    w_row = weight.reshape(1, D).astype(jnp.float32)      # lane-major weight row

    # ---- batch tiling: >= 2 tiles whenever possible so v7x's two TCs both get work.
    if B <= _SUBLANE:
        tm, nb = B, 1                                     # block == full batch dim
    else:
        nb = max(pl.cdiv(B, _TM_MAX), 2)
        tm = _round_up(pl.cdiv(B, nb), _SUBLANE)
        if tm > B:                                        # safety: keep block <= array dim
            tm = (B // _SUBLANE) * _SUBLANE
        nb = pl.cdiv(B, tm)

    # ---- feature (reduction) tiling: cdiv-based so padding is < one tile; the
    # ragged last tile is masked in-kernel (no zero-padded copy of x).
    if D <= _LANE:
        tk, nk = D, 1                                     # block == full feature dim
    else:
        nk = pl.cdiv(D, _TK_MAX)
        tk = _round_up(pl.cdiv(D, nk), _LANE)
        if tk > D:                                        # keep block <= array dim
            tk = (D // _LANE) * _LANE
        nk = pl.cdiv(D, tk)
    needs_mask = (D % tk) != 0

    # ---- fold bias + sigmoid + threshold into one logit-space scalar (SMEM).
    t = float(prediction_threshold)
    if 0.0 < t < 1.0:
        logit_t = math.log(t / (1.0 - t))
    elif t <= 0.0:
        logit_t = -math.inf                               # sigmoid(z) > t always true
    else:
        logit_t = math.inf                                # never true
    thr = (jnp.float32(logit_t) - bias.reshape(()).astype(jnp.float32)).reshape(1, 1)

    kernel = functools.partial(
        _logistic_kernel, tk=tk, valid_cols=D, needs_mask=needs_mask)

    return pl.pallas_call(
        kernel,
        out_shape=jax.ShapeDtypeStruct((B, 1), jnp.float32),
        grid_spec=pltpu.PrefetchScalarGridSpec(
            num_scalar_prefetch=0,
            grid=(nb, nk),                                       # reduction (D) axis last
            in_specs=[
                pl.BlockSpec((tm, tk), lambda i, k: (i, k)),         # x: streamed tiles
                pl.BlockSpec((1, tk), lambda i, k: (0, k)),          # w: lane-dense row slice
                pl.BlockSpec(memory_space=pltpu.MemorySpace.SMEM),   # folded threshold scalar
            ],
            out_specs=pl.BlockSpec((tm, 1), lambda i, k: (i, 0)),
            scratch_shapes=[pltpu.VMEM((tm, min(tk, _LANE)), jnp.float32)],  # lane-full acc
        ),
        compiler_params=pltpu.CompilerParams(
            dimension_semantics=("parallel", "arbitrary"),
            vmem_limit_bytes=40 * 1024 * 1024,   # 2 x 8 MiB x-buffers + acc, < v7x's 64 MiB
        ),
    )(x_flat, w_row, thr)


def reference_forward(x, weight, bias, prediction_threshold):
    B = x.shape[0]
    xf = x.reshape(B, -1).astype(jnp.float32)
    logits = xf @ weight.reshape(1, -1).T + bias.reshape(1, 1)
    return (jax.nn.sigmoid(logits) > prediction_threshold).astype(jnp.float32)


if __name__ == "__main__":
    key = jax.random.PRNGKey(0)
    k_x, k_w, k_b = jax.random.split(key, 3)

    B, C, H, W = 2, 4, 16, 16
    D = C * H * W
    prediction_threshold = 0.5

    x = jax.random.normal(k_x, (B, C, H, W), dtype=jnp.float32)
    # Deterministic "Linear(input_size, 1)" parameters (PyTorch shapes: weight (1, D), bias (1,))
    bound = 1.0 / (D ** 0.5)
    weight = jax.random.uniform(k_w, (1, D), minval=-bound, maxval=bound, dtype=jnp.float32)
    bias = jax.random.uniform(k_b, (1,), minval=-bound, maxval=bound, dtype=jnp.float32)

    preds = logistic_net_forward(x, weight, bias, prediction_threshold)
    preds = jax.block_until_ready(preds)

    ref = reference_forward(x, weight, bias, prediction_threshold)
    assert preds.shape == (B, 1), preds.shape
    assert jnp.array_equal(preds, ref), (preds, ref)

    print("KERNEL_OK")
</pallas_src>

<mosaic_0001>
module attributes {stable_mosaic.version = 11 : i64} {
  func.func @_logistic_kernel(%arg0: i32, %arg1: i32, %arg2: memref<2x1024xf32, #tpu.memory_space<vmem>>, %arg3: memref<1x1024xf32, #tpu.memory_space<vmem>>, %arg4: memref<1x1xf32, #tpu.memory_space<smem>>, %arg5: memref<2x1xf32, #tpu.memory_space<vmem>>, %arg6: memref<2x128xf32, #tpu.memory_space<vmem>>) attributes {dimension_semantics = [#tpu.dimension_semantics<parallel>, #tpu.dimension_semantics<arbitrary>], iteration_bounds = array<i64: 1, 1>, scalar_prefetch = 0 : i64, scratch_operands = 1 : i64, tpu.core_type = #tpu.core_type<tc>, window_params = [{transform_indices = @transform_0, window_bounds = array<i64: 2, 1024>}, {transform_indices = @transform_1, window_bounds = array<i64: 1, 1024>}, {transform_indices = @transform_2, window_bounds = array<i64: 1, 1>}, {transform_indices = @transform_3, window_bounds = array<i64: 2, 1>}]} {
    %c0_i32 = arith.constant 0 : i32
    %0 = arith.cmpi eq, %arg1, %c0_i32 : i32
    %1 = arith.extui %0 : i1 to i32
    %c0_i32_0 = arith.constant 0 : i32
    %2 = arith.cmpi ne, %1, %c0_i32_0 : i32
    scf.if %2 {
      %cst = arith.constant 0.000000e+00 : f32
      %62 = vector.broadcast %cst : f32 to vector<2x128xf32>
      %c0_59 = arith.constant 0 : index
      %c0_60 = arith.constant 0 : index
      %63 = vector.load %arg6[%c0_59, %c0_60] : memref<2x128xf32, #tpu.memory_space<vmem>>, vector<2x128xf32>
      tpu.vector_store %arg6[%c0_59, %c0_60], %62 {strides = array<i32>} : memref<2x128xf32, #tpu.memory_space<vmem>>, vector<2x128xf32>,
    } else {
    }
    %c0 = arith.constant 0 : index
    %c0_1 = arith.constant 0 : index
    %3 = vector.load %arg2[%c0, %c0_1] : memref<2x1024xf32, #tpu.memory_space<vmem>>, vector<2x128xf32>
    %c0_2 = arith.constant 0 : index
    %c0_3 = arith.constant 0 : index
    %4 = vector.load %arg3[%c0_2, %c0_3] : memref<1x1024xf32, #tpu.memory_space<vmem>>, vector<1x128xf32>
    %5 = vector.broadcast %4 : vector<1x128xf32> to vector<2x128xf32>
    %6 = arith.mulf %3, %5 : vector<2x128xf32>
    %c0_4 = arith.constant 0 : index
    %c0_5 = arith.constant 0 : index
    %7 = vector.load %arg6[%c0_4, %c0_5] : memref<2x128xf32, #tpu.memory_space<vmem>>, vector<2x128xf32>
    %8 = arith.addf %7, %6 : vector<2x128xf32>
    %c0_6 = arith.constant 0 : index
    %c0_7 = arith.constant 0 : index
    %9 = vector.load %arg6[%c0_6, %c0_7] : memref<2x128xf32, #tpu.memory_space<vmem>>, vector<2x128xf32>
    tpu.vector_store %arg6[%c0_6, %c0_7], %8 {strides = array<i32>} : memref<2x128xf32, #tpu.memory_space<vmem>>, vector<2x128xf32>,
    %c0_8 = arith.constant 0 : index
    %c128 = arith.constant 128 : index
    %10 = vector.load %arg2[%c0_8, %c128] : memref<2x1024xf32, #tpu.memory_space<vmem>>, vector<2x128xf32>
    %c0_9 = arith.constant 0 : index
    %c128_10 = arith.constant 128 : index
    %11 = vector.load %arg3[%c0_9, %c128_10] : memref<1x1024xf32, #tpu.memory_space<vmem>>, vector<1x128xf32>
    %12 = vector.broadcast %11 : vector<1x128xf32> to vector<2x128xf32>
    %13 = arith.mulf %10, %12 : vector<2x128xf32>
    %c0_11 = arith.constant 0 : index
    %c0_12 = arith.constant 0 : index
    %14 = vector.load %arg6[%c0_11, %c0_12] : memref<2x128xf32, #tpu.memory_space<vmem>>, vector<2x128xf32>
    %15 = arith.addf %14, %13 : vector<2x128xf32>
    %c0_13 = arith.constant 0 : index
    %c0_14 = arith.constant 0 : index
    %16 = vector.load %arg6[%c0_13, %c0_14] : memref<2x128xf32, #tpu.memory_space<vmem>>, vector<2x128xf32>
    tpu.vector_store %arg6[%c0_13, %c0_14], %15 {strides = array<i32>} : memref<2x128xf32, #tpu.memory_space<vmem>>, vector<2x128xf32>,
    %c0_15 = arith.constant 0 : index
    %c256 = arith.constant 256 : index
    %17 = vector.load %arg2[%c0_15, %c256] : memref<2x1024xf32, #tpu.memory_space<vmem>>, vector<2x128xf32>
    %c0_16 = arith.constant 0 : index
    %c256_17 = arith.constant 256 : index
    %18 = vector.load %arg3[%c0_16, %c256_17] : memref<1x1024xf32, #tpu.memory_space<vmem>>, vector<1x128xf32>
    %19 = vector.broadcast %18 : vector<1x128xf32> to vector<2x128xf32>
    %20 = arith.mulf %17, %19 : vector<2x128xf32>
    %c0_18 = arith.constant 0 : index
    %c0_19 = arith.constant 0 : index
    %21 = vector.load %arg6[%c0_18, %c0_19] : memref<2x128xf32, #tpu.memory_space<vmem>>, vector<2x128xf32>
    %22 = arith.addf %21, %20 : vector<2x128xf32>
    %c0_20 = arith.constant 0 : index
    %c0_21 = arith.constant 0 : index
    %23 = vector.load %arg6[%c0_20, %c0_21] : memref<2x128xf32, #tpu.memory_space<vmem>>, vector<2x128xf32>
    tpu.vector_store %arg6[%c0_20, %c0_21], %22 {strides = array<i32>} : memref<2x128xf32, #tpu.memory_space<vmem>>, vector<2x128xf32>,
    %c0_22 = arith.constant 0 : index
    %c384 = arith.constant 384 : index
    %24 = vector.load %arg2[%c0_22, %c384] : memref<2x1024xf32, #tpu.memory_space<vmem>>, vector<2x128xf32>
    %c0_23 = arith.constant 0 : index
    %c384_24 = arith.constant 384 : index
    %25 = vector.load %arg3[%c0_23, %c384_24] : memref<1x1024xf32, #tpu.memory_space<vmem>>, vector<1x128xf32>
    %26 = vector.broadcast %25 : vector<1x128xf32> to vector<2x128xf32>
    %27 = arith.mulf %24, %26 : vector<2x128xf32>
    %c0_25 = arith.constant 0 : index
    %c0_26 = arith.constant 0 : index
    %28 = vector.load %arg6[%c0_25, %c0_26] : memref<2x128xf32, #tpu.memory_space<vmem>>, vector<2x128xf32>
    %29 = arith.addf %28, %27 : vector<2x128xf32>
    %c0_27 = arith.constant 0 : index
    %c0_28 = arith.constant 0 : index
    %30 = vector.load %arg6[%c0_27, %c0_28] : memref<2x128xf32, #tpu.memory_space<vmem>>, vector<2x128xf32>
    tpu.vector_store %arg6[%c0_27, %c0_28], %29 {strides = array<i32>} : memref<2x128xf32, #tpu.memory_space<vmem>>, vector<2x128xf32>,
    %c0_29 = arith.constant 0 : index
    %c512 = arith.constant 512 : index
    %31 = vector.load %arg2[%c0_29, %c512] : memref<2x1024xf32, #tpu.memory_space<vmem>>, vector<2x128xf32>
    %c0_30 = arith.constant 0 : index
    %c512_31 = arith.constant 512 : index
    %32 = vector.load %arg3[%c0_30, %c512_31] : memref<1x1024xf32, #tpu.memory_space<vmem>>, vector<1x128xf32>
    %33 = vector.broadcast %32 : vector<1x128xf32> to vector<2x128xf32>
    %34 = arith.mulf %31, %33 : vector<2x128xf32>
    %c0_32 = arith.constant 0 : index
    %c0_33 = arith.constant 0 : index
    %35 = vector.load %arg6[%c0_32, %c0_33] : memref<2x128xf32, #tpu.memory_space<vmem>>, vector<2x128xf32>
    %36 = arith.addf %35, %34 : vector<2x128xf32>
    %c0_34 = arith.constant 0 : index
    %c0_35 = arith.constant 0 : index
    %37 = vector.load %arg6[%c0_34, %c0_35] : memref<2x128xf32, #tpu.memory_space<vmem>>, vector<2x128xf32>
    tpu.vector_store %arg6[%c0_34, %c0_35], %36 {strides = array<i32>} : memref<2x128xf32, #tpu.memory_space<vmem>>, vector<2x128xf32>,
    %c0_36 = arith.constant 0 : index
    %c640 = arith.constant 640 : index
    %38 = vector.load %arg2[%c0_36, %c640] : memref<2x1024xf32, #tpu.memory_space<vmem>>, vector<2x128xf32>
    %c0_37 = arith.constant 0 : index
    %c640_38 = arith.constant 640 : index
    %39 = vector.load %arg3[%c0_37, %c640_38] : memref<1x1024xf32, #tpu.memory_space<vmem>>, vector<1x128xf32>
    %40 = vector.broadcast %39 : vector<1x128xf32> to vector<2x128xf32>
    %41 = arith.mulf %38, %40 : vector<2x128xf32>
    %c0_39 = arith.constant 0 : index
    %c0_40 = arith.constant 0 : index
    %42 = vector.load %arg6[%c0_39, %c0_40] : memref<2x128xf32, #tpu.memory_space<vmem>>, vector<2x128xf32>
    %43 = arith.addf %42, %41 : vector<2x128xf32>
    %c0_41 = arith.constant 0 : index
    %c0_42 = arith.constant 0 : index
    %44 = vector.load %arg6[%c0_41, %c0_42] : memref<2x128xf32, #tpu.memory_space<vmem>>, vector<2x128xf32>
    tpu.vector_store %arg6[%c0_41, %c0_42], %43 {strides = array<i32>} : memref<2x128xf32, #tpu.memory_space<vmem>>, vector<2x128xf32>,
    %c0_43 = arith.constant 0 : index
    %c768 = arith.constant 768 : index
    %45 = vector.load %arg2[%c0_43, %c768] : memref<2x1024xf32, #tpu.memory_space<vmem>>, vector<2x128xf32>
    %c0_44 = arith.constant 0 : index
    %c768_45 = arith.constant 768 : index
    %46 = vector.load %arg3[%c0_44, %c768_45] : memref<1x1024xf32, #tpu.memory_space<vmem>>, vector<1x128xf32>
    %47 = vector.broadcast %46 : vector<1x128xf32> to vector<2x128xf32>
    %48 = arith.mulf %45, %47 : vector<2x128xf32>
    %c0_46 = arith.constant 0 : index
    %c0_47 = arith.constant 0 : index
    %49 = vector.load %arg6[%c0_46, %c0_47] : memref<2x128xf32, #tpu.memory_space<vmem>>, vector<2x128xf32>
    %50 = arith.addf %49, %48 : vector<2x128xf32>
    %c0_48 = arith.constant 0 : index
    %c0_49 = arith.constant 0 : index
    %51 = vector.load %arg6[%c0_48, %c0_49] : memref<2x128xf32, #tpu.memory_space<vmem>>, vector<2x128xf32>
    tpu.vector_store %arg6[%c0_48, %c0_49], %50 {strides = array<i32>} : memref<2x128xf32, #tpu.memory_space<vmem>>, vector<2x128xf32>,
    %c0_50 = arith.constant 0 : index
    %c896 = arith.constant 896 : index
    %52 = vector.load %arg2[%c0_50, %c896] : memref<2x1024xf32, #tpu.memory_space<vmem>>, vector<2x128xf32>
    %c0_51 = arith.constant 0 : index
    %c896_52 = arith.constant 896 : index
    %53 = vector.load %arg3[%c0_51, %c896_52] : memref<1x1024xf32, #tpu.memory_space<vmem>>, vector<1x128xf32>
    %54 = vector.broadcast %53 : vector<1x128xf32> to vector<2x128xf32>
    %55 = arith.mulf %52, %54 : vector<2x128xf32>
    %c0_53 = arith.constant 0 : index
    %c0_54 = arith.constant 0 : index
    %56 = vector.load %arg6[%c0_53, %c0_54] : memref<2x128xf32, #tpu.memory_space<vmem>>, vector<2x128xf32>
    %57 = arith.addf %56, %55 : vector<2x128xf32>
    %c0_55 = arith.constant 0 : index
    %c0_56 = arith.constant 0 : index
    %58 = vector.load %arg6[%c0_55, %c0_56] : memref<2x128xf32, #tpu.memory_space<vmem>>, vector<2x128xf32>
    tpu.vector_store %arg6[%c0_55, %c0_56], %57 {strides = array<i32>} : memref<2x128xf32, #tpu.memory_space<vmem>>, vector<2x128xf32>,
    %c0_i32_57 = arith.constant 0 : i32
    %59 = arith.cmpi eq, %arg1, %c0_i32_57 : i32
    %60 = arith.extui %59 : i1 to i32
    %c0_i32_58 = arith.constant 0 : i32
    %61 = arith.cmpi ne, %60, %c0_i32_58 : i32
    scf.if %61 {
      %c0_59 = arith.constant 0 : index
      %c0_60 = arith.constant 0 : index
      %62 = vector.load %arg6[%c0_59, %c0_60] : memref<2x128xf32, #tpu.memory_space<vmem>>, vector<2x128xf32>
      %cst = arith.constant dense<0.000000e+00> : vector<2xf32>
      %63 = vector.multi_reduction <add>, %62, %cst [1] : vector<2x128xf32> to vector<2xf32>
      %64 = vector.shape_cast %63 : vector<2xf32> to vector<2x1xf32>
      %c0_61 = arith.constant 0 : index
      %c0_62 = arith.constant 0 : index
      %65 = memref.load %arg4[%c0_61, %c0_62] : memref<1x1xf32, #tpu.memory_space<smem>>
      %66 = vector.broadcast %65 : f32 to vector<2x1xf32>
      %67 = arith.cmpf ogt, %64, %66 : vector<2x1xf32>
      %68 = arith.extui %67 : vector<2x1xi1> to vector<2x1xi32>
      %69 = arith.sitofp %68 : vector<2x1xi32> to vector<2x1xf32>
      %c0_63 = arith.constant 0 : index
      %c0_64 = arith.constant 0 : index
      %70 = vector.load %arg5[%c0_63, %c0_64] : memref<2x1xf32, #tpu.memory_space<vmem>>, vector<2x1xf32>
      tpu.vector_store %arg5[%c0_63, %c0_64], %69 {strides = array<i32>} : memref<2x1xf32, #tpu.memory_space<vmem>>, vector<2x1xf32>,
    } else {
    }
    return
  }
  func.func @transform_0(%arg0: i32, %arg1: i32) -> (i32, i32) {
    %c0_i32 = arith.constant 0 : i32
    return %arg0, %arg1 : i32, i32
  }
  func.func @transform_1(%arg0: i32, %arg1: i32) -> (i32, i32) {
    %c0_i32 = arith.constant 0 : i32
    %c0_i32_0 = arith.constant 0 : i32
    return %c0_i32, %arg1 : i32, i32
  }
  func.func @transform_2(%arg0: i32, %arg1: i32) -> (i32, i32) {
    %c0_i32 = arith.constant 0 : i32
    %c0_i32_0 = arith.constant 0 : i32
    %c0_i32_1 = arith.constant 0 : i32
    return %c0_i32, %c0_i32_0 : i32, i32
  }
  func.func @transform_3(%arg0: i32, %arg1: i32) -> (i32, i32) {
    %c0_i32 = arith.constant 0 : i32
    %c0_i32_0 = arith.constant 0 : i32
    return %arg0, %c0_i32 : i32, i32
  }
}

</mosaic_0001>

<bundles_post_ra>
// kernel: tpu_custom_call.1
= control target key start
LH: loop header
LB: loop body
LE: loop exit
PB: predicated region body
PF: predicated region fallthrough
CT: control target
= control target key end

     0   :  { %9 = vsyncpa [#allocation5], 0  ;;  %s252_s0 = inlined_call_operand.hbm [shape: f32[2,1024], index: 0, kind: input, shape index: {}]   ;;  %s253_s1 = inlined_call_operand.hbm [shape: f32[1,1024], index: 1, kind: input, shape index: {}]   ;;  %s254_s2 = inlined_call_operand.<no memory space> [shape: f32[1,1], index: 2, kind: input, shape index: {}]   ;;  %s255_s3 = inlined_call_operand.vmem [shape: f32[2,1], index: 3, kind: output, shape index: {}]  }
   0x1   :  { %10 = vsyncpa [#allocation7], 0  ;;  %s217_s12 = smov [#allocation4]   ;;  %s218_s14 = smov [#allocation6]  }
   0x2   :  { %s17_s13 = sshll.u32 %s217_s12, 4  ;;  %s27_s15 = sshll.u32 %s218_s14, 4  ;;  %s18_s13 = int_to_ptr.vmem [resolvable:$true] %s17_s13  ;;  %s28_s15 = int_to_ptr.vmem [resolvable:$true] %s27_s15 }
   0x3   :  { %s181_s16 = scalar_lea.vmem %s18_s13, 256  ;;  %p186_p1 = scmp.lt.s32.totalorder %s18_s13, %s18_s13 }
   0x4   :  { %p182_p0 = scmp.ne.s32.totalorder %s18_s13, %s181_s16  ;;  %p187_p2 = scmp.lt.s32.totalorder %s181_s16, %s181_s16 }
   0x6   :  { %p188_p3 = por %p187_p2, %p186_p1 }
   0x8   :  { %p189_p4 = pnand %p188_p3, %p182_p0 }
   0xa   :  { %192 = shalt.err (!%p189_p4)
}
   0xb   :  { %20 = dma.hbm_to_vmem [thread:$0]  %s252_s0, 256, %s18_s13, [#allocation5]  }
   0xc   :  { %s201_s19 = scalar_lea.vmem %s28_s15, 128  ;;  %p206_p6 = scmp.lt.s32.totalorder %s28_s15, %s28_s15 }
   0xd   :  { %p202_p5 = scmp.ne.s32.totalorder %s28_s15, %s201_s19  ;;  %p207_p7 = scmp.lt.s32.totalorder %s201_s19, %s201_s19 }
   0xf   :  { %p208_p8 = por %p207_p7, %p206_p6 }
  0x11   :  { %p209_p9 = pnand %p208_p8, %p202_p5 }
  0x13   :  { %212 = shalt.err (!%p209_p9)
}
  0x14   :  { %30 = dma.hbm_to_vmem [thread:$0]  %s253_s1, 128, %s28_s15, [#allocation7]  }
  0x15   :  { %213 = dma.done.wait [#allocation5], 256  }
  0x16   :  { %214 = vsyncadd [#allocation5], 4294967040 }
  0x17   :  { %215 = dma.done.wait [#allocation7], 128  }
  0x18   :  { %216 = vsyncadd [#allocation7], 4294967168  ;;  %v219_v0 = vmov 0.0   ;;  %v44_v1 = vld [vmem:[#allocation4] sm:$0x3]  ;;  %vm144_vm0 = vcmask 1041408   ;;  %v149_v43 = vstv %s254_s2 }
  0x19   :  { %43 = vst [vmem:[#allocation2] sm:$0x3] %v219_v0  ;;  %v161_v2 = vld [vmem:[#allocation6] ss:$0 sm:$0xff]  ;;  %v56_v6 = vld [vmem:[#allocation4 + $0x2] sm:$0x3] }
  0x1a   :  { %v52_v3 = vmul.f32 %v161_v2, %v44_v1  ;;  %v162_v7 = vld [vmem:[#allocation6 + $0x1] ss:$0 sm:$0xff]  ;;  %v68_v11 = vld [vmem:[#allocation4 + $0x4] sm:$0x3]  ;;  %v163_v12 = vld [vmem:[#allocation6 + $0x2] ss:$0 sm:$0xff] }
  0x1b   :  { %v64_v8 = vmul.f32 %v162_v7, %v56_v6  ;;  %v76_v13 = vmul.f32 %v163_v12, %v68_v11  ;;  %v80_v16 = vld [vmem:[#allocation4 + $0x6] sm:$0x3]  ;;  %v164_v17 = vld [vmem:[#allocation6 + $0x3] ss:$0 sm:$0xff]  ;;  %v92_v21 = vld [vmem:[#allocation4 + $0x8] sm:$0x3] }
  0x1c   :  { %v88_v18 = vmul.f32 %v164_v17, %v80_v16  ;;  %v165_v22 = vld [vmem:[#allocation6 + $0x4] ss:$0 sm:$0xff]  ;;  %v104_v26 = vld [vmem:[#allocation4 + $0xa] sm:$0x3]  ;;  %v166_v27 = vld [vmem:[#allocation6 + $0x5] ss:$0 sm:$0xff] }
  0x1d   :  { %v100_v23 = vmul.f32 %v165_v22, %v92_v21  ;;  %v112_v28 = vmul.f32 %v166_v27, %v104_v26  ;;  %v116_v31 = vld [vmem:[#allocation4 + $0xc] sm:$0x3]  ;;  %v167_v32 = vld [vmem:[#allocation6 + $0x6] ss:$0 sm:$0xff]  ;;  %v128_v36 = vld [vmem:[#allocation4 + $0xe] sm:$0x3] }
  0x1e   :  { %v124_v33 = vmul.f32 %v167_v32, %v116_v31  ;;  %v168_v37 = vld [vmem:[#allocation6 + $0x7] ss:$0 sm:$0xff]  ;;  %vm153_vm1 = vcmask 1024  }
  0x1f   :  { %v136_v38 = vmul.f32 %v168_v37, %v128_v36 }
  0x20   :  { %v53_v4 = vld [vmem:[#allocation2] sm:$0x3] }
  0x21   :  { %v54_v5 = vadd.f32 %v53_v4, %v52_v3 }
  0x23   :  { %55 = vst [vmem:[#allocation2] sm:$0x3] %v54_v5 }
  0x2a   :  { %v65_v9 = vld [vmem:[#allocation2] sm:$0x3] }
  0x2b   :  { %v66_v10 = vadd.f32 %v65_v9, %v64_v8 }
  0x2d   :  { %67 = vst [vmem:[#allocation2] sm:$0x3] %v66_v10 }
  0x34   :  { %v77_v14 = vld [vmem:[#allocation2] sm:$0x3] }
  0x35   :  { %v78_v15 = vadd.f32 %v77_v14, %v76_v13 }
  0x37   :  { %79 = vst [vmem:[#allocation2] sm:$0x3] %v78_v15 }
  0x3e   :  { %v89_v19 = vld [vmem:[#allocation2] sm:$0x3] }
  0x3f   :  { %v90_v20 = vadd.f32 %v89_v19, %v88_v18 }
  0x41   :  { %91 = vst [vmem:[#allocation2] sm:$0x3] %v90_v20 }
  0x48   :  { %v101_v24 = vld [vmem:[#allocation2] sm:$0x3] }
  0x49   :  { %v102_v25 = vadd.f32 %v101_v24, %v100_v23 }
  0x4b   :  { %103 = vst [vmem:[#allocation2] sm:$0x3] %v102_v25 }
  0x52   :  { %v113_v29 = vld [vmem:[#allocation2] sm:$0x3] }
  0x53   :  { %v114_v30 = vadd.f32 %v113_v29, %v112_v28 }
  0x55   :  { %115 = vst [vmem:[#allocation2] sm:$0x3] %v114_v30 }
  0x5c   :  { %v125_v34 = vld [vmem:[#allocation2] sm:$0x3] }
  0x5d   :  { %v126_v35 = vadd.f32 %v125_v34, %v124_v33 }
  0x5f   :  { %127 = vst [vmem:[#allocation2] sm:$0x3] %v126_v35 }
  0x66   :  { %v137_v39 = vld [vmem:[#allocation2] sm:$0x3] }
  0x67   :  { %v138_v40 = vadd.f32 %v137_v39, %v136_v38 }
  0x69   :  { %139 = vst [vmem:[#allocation2] sm:$0x3] %v138_v40 }
  0x70   :  { %v143_v41 = vld [vmem:[#allocation2] sm:$0x3] }
  0x71   :  { %v145_v42 = vsel %vm144_vm0, %v143_v41, 0.0 }
  0x72   :  { %146 = vadd.xlane.f32.xlu0 %v145_v42 }
  0xfb   :  { %v147_v44 = vpop.xlane.xlu0 %146 }
  0xfc   :  { %vm150_vm2 = vcmp.gt.f32.partialorder %v147_v44, %v149_v43 }
  0xfd   :  { %v169_v45 = vsel %vm150_vm2, 1.0, %v219_v0 }
  0xfe   :  { %154 = vst.msk [vmem:[%s255_s3] sm:$0x3] %vm153_vm1, %v169_v45 }
  0xff   :  { %159 = vsyncpa [#allocation5], 1 }
 0x100   :  { %160 = vsyncpa [#allocation7], 1 }

</bundles_post_ra>
